<compile_context>
chip_gen: v7x
topology: tpu7x:2x2x1
jax: 0.10.0
libtpu: 0.0.40
codegen_flags: <defaults>
</compile_context>

<pallas_src>
import jax
import jax.numpy as jnp
from jax import lax
from jax.experimental import pallas as pl
from jax.experimental.pallas import tpu as pltpu

_HALO = 8      # halo blocks are 8 rows tall (f32 sublane granularity)
_LANES = 128


def _cdiv(a, b):
    return -(-a // b)


def _round_up(a, b):
    return _cdiv(a, b) * b


def _vmem_capacity_bytes():
    try:
        return int(pltpu.get_tpu_info().vmem_capacity_bytes)
    except Exception:
        return 64 * 1024 * 1024      # conservative default (v7x per-TC VMEM)


def _roll(x, shift, axis):
    # pltpu.roll with a non-negative (static) shift; matches jnp.roll semantics.
    return pltpu.roll(x, shift % x.shape[axis], axis)


def _make_kernel(thres, C, TH, W, SH):
    """Kernel over one (1, C, TH, W) tile plus two (1, C, 8, W) H-halo blocks."""
    n_strips = TH // SH
    single_channel = (C == 1)

    def kernel(x_ref, top_ref, bot_ref, o_ref):
        h = pl.program_id(1)
        nh = pl.num_programs(1)

        # ---- boundary masks: built once per tile, shared by min AND max ----
        lane = lax.broadcasted_iota(jnp.int32, (SH, W), 1)
        ml = lane == 0                       # left frame edge  (zero pad)
        mr = lane == (W - 1)                 # right frame edge (zero pad)
        ml1 = ml[0:1, :]                     # (1, W) variants for row passes
        mr1 = mr[0:1, :]
        row = lax.broadcasted_iota(jnp.int32, (SH, W), 0)
        mtop = row == 0                      # first row of a strip
        mbot = row == (SH - 1)               # last row of a strip

        zero_row = jnp.zeros((1, W), jnp.float32)

        def creduce(x):                      # (C, R, W) -> (R, W), (R, W)
            if single_channel:
                v = x[0]
                return v, v
            return jnp.min(x, axis=0), jnp.max(x, axis=0)

        def h3pair(cmin, cmax, left_m, right_m):
            # 3-tap min/max along W with zero fill at the frame edge.
            zl = jnp.where(left_m, 0.0, _roll(cmin, 1, axis=1))
            zr = jnp.where(right_m, 0.0, _roll(cmin, -1, axis=1))
            hmin = jnp.minimum(cmin, jnp.minimum(zl, zr))
            if single_channel:               # cmin is cmax: reuse shifted taps
                hmax = jnp.maximum(cmax, jnp.maximum(zl, zr))
            else:
                zl = jnp.where(left_m, 0.0, _roll(cmax, 1, axis=1))
                zr = jnp.where(right_m, 0.0, _roll(cmax, -1, axis=1))
                hmax = jnp.maximum(cmax, jnp.maximum(zl, zr))
            return hmin, hmax

        def row_minmax(x_row):               # (C, 1, W) -> (1, W), (1, W)
            rmin, rmax = creduce(x_row)
            return h3pair(rmin, rmax, ml1, mr1)

        # Rows just above / below this tile (channel + horizontally reduced),
        # with zero-pad semantics at the frame boundary (NaN-safe select).
        tmin_h, tmax_h = row_minmax(top_ref[0, :, _HALO - 1:_HALO, :])
        tmin_h = jnp.where(h > 0, tmin_h, zero_row)
        tmax_h = jnp.where(h > 0, tmax_h, zero_row)
        bmin_h, bmax_h = row_minmax(bot_ref[0, :, 0:1, :])
        bmin_h = jnp.where(h < nh - 1, bmin_h, zero_row)
        bmax_h = jnp.where(h < nh - 1, bmax_h, zero_row)

        def strip_body(s):
            static = isinstance(s, int)
            r0 = s * SH
            if not static:
                r0 = pl.multiple_of(r0, 8)

            xs = x_ref[0, :, pl.ds(r0, SH), :]          # (C, SH, W)
            cmin, cmax = creduce(xs)
            hmin, hmax = h3pair(cmin, cmax, ml, mr)

            # Row just above this strip (from tile data or the top halo).
            if static:
                if s > 0:
                    xt = x_ref[0, :, pl.ds(r0 - _HALO, _HALO), :]
                    tmin, tmax = row_minmax(xt[:, _HALO - 1:_HALO, :])
                else:
                    tmin, tmax = tmin_h, tmax_h
            else:
                rt = pl.multiple_of(jnp.maximum(r0 - _HALO, 0), 8)
                xt = x_ref[0, :, pl.ds(rt, _HALO), :]
                tmin_x, tmax_x = row_minmax(xt[:, _HALO - 1:_HALO, :])
                tmin = jnp.where(s > 0, tmin_x, tmin_h)
                tmax = jnp.where(s > 0, tmax_x, tmax_h)

            # Row just below this strip (from tile data or the bottom halo).
            if static:
                if s < n_strips - 1:
                    xb = x_ref[0, :, pl.ds(r0 + SH, _HALO), :]
                    bmin, bmax = row_minmax(xb[:, 0:1, :])
                else:
                    bmin, bmax = bmin_h, bmax_h
            else:
                rb = pl.multiple_of(
                    jnp.where(s < n_strips - 1, r0 + SH, 0), 8)
                xb = x_ref[0, :, pl.ds(rb, _HALO), :]
                bmin_x, bmax_x = row_minmax(xb[:, 0:1, :])
                bmin = jnp.where(s < n_strips - 1, bmin_x, bmin_h)
                bmax = jnp.where(s < n_strips - 1, bmax_x, bmax_h)

            # 3-tap along H (sublane rolls; boundary rows take neighbor rows).
            up = jnp.where(mtop, tmin, _roll(hmin, 1, axis=0))
            dn = jnp.where(mbot, bmin, _roll(hmin, -1, axis=0))
            vmin = jnp.minimum(hmin, jnp.minimum(up, dn))
            up = jnp.where(mtop, tmax, _roll(hmax, 1, axis=0))
            dn = jnp.where(mbot, bmax, _roll(hmax, -1, axis=0))
            vmax = jnp.maximum(hmax, jnp.maximum(up, dn))

            o_ref[0, 0, pl.ds(r0, SH), :] = (
                (vmax - vmin) > thres).astype(o_ref.dtype)

        if n_strips <= 8:
            for s in range(n_strips):        # fully unrolled at trace time
                strip_body(s)
        else:
            def fori_body(s, carry):
                strip_body(s)
                return carry
            lax.fori_loop(0, n_strips, fori_body, 0)

    return kernel


def _plan_tiles(B, C, H, W, max_rows_per_tile):
    Wp = _round_up(W, _LANES)
    Hp8 = _round_up(H, 8)

    # Strip height: keep the per-strip min/max chain resident in vregs
    # (~6 live (SH, Wp) f32 temporaries should fit in the 64 x 4 KiB vreg file).
    sh_target = max(8, min(64, ((8192 // Wp) // 8) * 8))

    vmem_cap = _vmem_capacity_bytes()
    budget = int(vmem_cap * 0.6)                    # headroom for Mosaic internals
    per_row = (2 * C + 2) * Wp * 4                  # in + out blocks, double-buffered
    fixed = 2 * 2 * C * _HALO * Wp * 4              # two 8-row halos, double-buffered
    fixed += 2 << 20                                # strip temporaries + misc
    max_rows = max(8, ((budget - fixed) // per_row // 8) * 8)
    if max_rows_per_tile is not None:
        max_rows = min(max_rows, max(8, (int(max_rows_per_tile) // 8) * 8))

    n_h = _cdiv(Hp8, max_rows)
    if B * n_h < 2 and Hp8 >= 16:
        n_h = 2                                     # keep both v7x TensorCores busy
    th8 = _round_up(_cdiv(Hp8, n_h), 8)
    sh = min(sh_target, th8)
    th = _round_up(th8, sh)                         # tile rows: multiple of strip
    hp = n_h * th                                   # padded H (tiny extra rows)
    return Wp, hp, th, sh, n_h, vmem_cap


def extract_depth_edge_mask(batch_depth, thres, *, max_rows_per_tile=None):
    """batch_depth: (B, C, H, W). Returns (B, 1, H, W) float32 edge mask."""
    x = jnp.asarray(batch_depth)
    B, C, H, W = x.shape
    if x.dtype != jnp.float32:
        x = x.astype(jnp.float32)   # match PyTorch f32 unfold/threshold semantics

    Wp, Hp, TH, SH, nH, vmem_cap = _plan_tiles(B, C, H, W, max_rows_per_tile)

    if (Hp, Wp) != (H, W):
        # Bottom/right zero padding reproduces unfold's zero pad for the last
        # real row/column; the padded outputs are sliced off below.
        x = jnp.pad(x, ((0, 0), (0, 0), (0, Hp - H), (0, Wp - W)))

    kernel = _make_kernel(float(thres), C, TH, Wp, SH)

    bh = TH // _HALO            # 8-row blocks per tile
    nhb = Hp // _HALO           # 8-row blocks in (padded) H

    in_specs = [
        pl.BlockSpec((1, C, TH, Wp), lambda b, h: (b, 0, h, 0)),
        # 8 rows just above the tile (clamped; zero-gated in kernel at h == 0)
        pl.BlockSpec((1, C, _HALO, Wp),
                     lambda b, h: (b, 0, jnp.maximum(h * bh - 1, 0), 0)),
        # 8 rows just below the tile (clamped; zero-gated in kernel at h == nH-1)
        pl.BlockSpec((1, C, _HALO, Wp),
                     lambda b, h: (b, 0, jnp.minimum((h + 1) * bh, nhb - 1), 0)),
    ]
    out_specs = pl.BlockSpec((1, 1, TH, Wp), lambda b, h: (b, 0, h, 0))

    # Per-generation VMEM sizing (v7x: 64 MiB, v5e/v6e: 128 MiB).
    usage = (2 * C * TH * Wp * 4            # main input block, double-buffered
             + 2 * TH * Wp * 4              # output block, double-buffered
             + 2 * 2 * C * _HALO * Wp * 4   # halo blocks, double-buffered
             + (4 << 20))                   # strip temporaries + margin
    vmem_limit = max(16 << 20, min(int(vmem_cap * 0.9), usage))

    out = pl.pallas_call(
        kernel,
        out_shape=jax.ShapeDtypeStruct((B, 1, Hp, Wp), jnp.float32),
        grid=(B, nH),
        in_specs=in_specs,
        out_specs=out_specs,
        compiler_params=pltpu.CompilerParams(
            dimension_semantics=("parallel", "parallel"),
            vmem_limit_bytes=int(vmem_limit),
        ),
    )(x, x, x)

    if (Hp, Wp) != (H, W):
        out = out[:, :, :H, :W]
    return out


def _reference(batch_depth, thres):
    """Pure-JAX reference of the PyTorch forward (for self-check)."""
    x = jnp.asarray(batch_depth, jnp.float32)
    B, C, H, W = x.shape
    xp = jnp.pad(x, ((0, 0), (0, 0), (1, 1), (1, 1)))
    patches = [xp[:, :, dy:dy + H, dx:dx + W]
               for dy in range(3) for dx in range(3)]
    p = jnp.concatenate(patches, axis=1)
    min_v = p.min(axis=1, keepdims=True)
    max_v = p.max(axis=1, keepdims=True)
    return ((max_v - min_v) > thres).astype(jnp.float32)


if __name__ == "__main__":
    key = jax.random.PRNGKey(0)
    k1, k2, k3 = jax.random.split(key, 3)

    # Case 1: module-shaped small input; W padded 16 -> 128, C > 1.
    B, C, H, W = 2, 4, 16, 16
    thres = 0.95
    depth = jax.random.uniform(k1, (B, C, H, W), dtype=jnp.float32)
    mask = jax.block_until_ready(extract_depth_edge_mask(depth, thres))
    assert mask.shape == (B, 1, H, W) and mask.dtype == jnp.float32
    assert jnp.array_equal(mask, _reference(depth, thres))

    # Case 2: H-tiled halo path + multi-strip loop (nH = 2, n_strips = 2), C == 1.
    B2, C2, H2, W2 = 2, 1, 128, 256
    thres2 = 0.85
    depth2 = jax.random.uniform(k2, (B2, C2, H2, W2), dtype=jnp.float32)
    mask2 = jax.block_until_ready(
        extract_depth_edge_mask(depth2, thres2, max_rows_per_tile=64))
    assert mask2.shape == (B2, 1, H2, W2) and mask2.dtype == jnp.float32
    assert jnp.array_equal(mask2, _reference(depth2, thres2))

    # Case 3: ragged H/W (padded to 16 x 128), B == 1 (forced 2-tile split).
    B3, C3, H3, W3 = 1, 3, 13, 20
    thres3 = 0.5
    depth3 = jax.random.uniform(k3, (B3, C3, H3, W3), dtype=jnp.float32)
    mask3 = jax.block_until_ready(extract_depth_edge_mask(depth3, thres3))
    assert mask3.shape == (B3, 1, H3, W3) and mask3.dtype == jnp.float32
    assert jnp.array_equal(mask3, _reference(depth3, thres3))

    print("KERNEL_OK")
</pallas_src>

<mosaic_0001>
module attributes {stable_mosaic.version = 11 : i64} {
  func.func @kernel(%arg0: i32, %arg1: i32, %arg2: memref<1x4x16x128xf32, #tpu.memory_space<vmem>>, %arg3: memref<1x4x8x128xf32, #tpu.memory_space<vmem>>, %arg4: memref<1x4x8x128xf32, #tpu.memory_space<vmem>>, %arg5: memref<1x1x16x128xf32, #tpu.memory_space<vmem>>) attributes {dimension_semantics = [#tpu.dimension_semantics<parallel>, #tpu.dimension_semantics<parallel>], iteration_bounds = array<i64: 2, 1>, scalar_prefetch = 0 : i64, scratch_operands = 0 : i64, tpu.core_type = #tpu.core_type<tc>, window_params = [{transform_indices = @transform_0, window_bounds = array<i64: 1, 4, 16, 128>}, {transform_indices = @transform_1, window_bounds = array<i64: 1, 4, 8, 128>}, {transform_indices = @transform_2, window_bounds = array<i64: 1, 4, 8, 128>}, {transform_indices = @transform_3, window_bounds = array<i64: 1, 1, 16, 128>}]} {
    %0 = tpu.iota {dimensions = array<i32: 1>} : vector<16x128xi32>
    %c0_i32 = arith.constant 0 : i32
    %1 = vector.broadcast %c0_i32 : i32 to vector<16x128xi32>
    %2 = arith.cmpi eq, %0, %1 : vector<16x128xi32>
    %c127_i32 = arith.constant 127 : i32
    %3 = vector.broadcast %c127_i32 : i32 to vector<16x128xi32>
    %4 = arith.cmpi eq, %0, %3 : vector<16x128xi32>
    %5 = vector.extract_strided_slice %2 {offsets = [0, 0], sizes = [1, 128], strides = [1, 1]} : vector<16x128xi1> to vector<1x128xi1>
    %6 = vector.extract_strided_slice %4 {offsets = [0, 0], sizes = [1, 128], strides = [1, 1]} : vector<16x128xi1> to vector<1x128xi1>
    %7 = tpu.iota {dimensions = array<i32: 0>} : vector<16x128xi32>
    %c0_i32_0 = arith.constant 0 : i32
    %8 = vector.broadcast %c0_i32_0 : i32 to vector<16x128xi32>
    %9 = arith.cmpi eq, %7, %8 : vector<16x128xi32>
    %c15_i32 = arith.constant 15 : i32
    %10 = vector.broadcast %c15_i32 : i32 to vector<16x128xi32>
    %11 = arith.cmpi eq, %7, %10 : vector<16x128xi32>
    %cst = arith.constant 0.000000e+00 : f32
    %12 = vector.broadcast %cst : f32 to vector<1x128xf32>
    %c0 = arith.constant 0 : index
    %c0_1 = arith.constant 0 : index
    %c7 = arith.constant 7 : index
    %c0_2 = arith.constant 0 : index
    %13 = vector.load %arg3[%c0, %c0_1, %c7, %c0_2] : memref<1x4x8x128xf32, #tpu.memory_space<vmem>>, vector<1x4x1x128xf32>
    %14 = vector.shape_cast %13 : vector<1x4x1x128xf32> to vector<4x1x128xf32>
    %cst_3 = arith.constant dense<0x7F800000> : vector<1x128xf32>
    %15 = vector.multi_reduction <minimumf>, %14, %cst_3 [0] : vector<4x1x128xf32> to vector<1x128xf32>
    %cst_4 = arith.constant dense<0xFF800000> : vector<1x128xf32>
    %16 = vector.multi_reduction <maximumf>, %14, %cst_4 [0] : vector<4x1x128xf32> to vector<1x128xf32>
    %c1_i32 = arith.constant 1 : i32
    %17 = tpu.dynamic_rotate %15 by %c1_i32 dim 1 : vector<1x128xf32>, i32 -> vector<1x128xf32>
    %cst_5 = arith.constant 0.000000e+00 : f32
    %18 = vector.broadcast %cst_5 : f32 to vector<1x128xf32>
    %19 = arith.select %5, %18, %17 : vector<1x128xi1>, vector<1x128xf32>
    %c127_i32_6 = arith.constant 127 : i32
    %20 = tpu.dynamic_rotate %15 by %c127_i32_6 dim 1 : vector<1x128xf32>, i32 -> vector<1x128xf32>
    %cst_7 = arith.constant 0.000000e+00 : f32
    %21 = vector.broadcast %cst_7 : f32 to vector<1x128xf32>
    %22 = arith.select %6, %21, %20 : vector<1x128xi1>, vector<1x128xf32>
    %23 = arith.minimumf %19, %22 : vector<1x128xf32>
    %24 = arith.minimumf %15, %23 : vector<1x128xf32>
    %c1_i32_8 = arith.constant 1 : i32
    %25 = tpu.dynamic_rotate %16 by %c1_i32_8 dim 1 : vector<1x128xf32>, i32 -> vector<1x128xf32>
    %cst_9 = arith.constant 0.000000e+00 : f32
    %26 = vector.broadcast %cst_9 : f32 to vector<1x128xf32>
    %27 = arith.select %5, %26, %25 : vector<1x128xi1>, vector<1x128xf32>
    %c127_i32_10 = arith.constant 127 : i32
    %28 = tpu.dynamic_rotate %16 by %c127_i32_10 dim 1 : vector<1x128xf32>, i32 -> vector<1x128xf32>
    %cst_11 = arith.constant 0.000000e+00 : f32
    %29 = vector.broadcast %cst_11 : f32 to vector<1x128xf32>
    %30 = arith.select %6, %29, %28 : vector<1x128xi1>, vector<1x128xf32>
    %31 = arith.maximumf %27, %30 : vector<1x128xf32>
    %32 = arith.maximumf %16, %31 : vector<1x128xf32>
    %c0_i32_12 = arith.constant 0 : i32
    %33 = arith.cmpi sgt, %arg1, %c0_i32_12 : i32
    %34 = arith.select %33, %24, %12 : vector<1x128xf32>
    %c0_i32_13 = arith.constant 0 : i32
    %35 = arith.cmpi sgt, %arg1, %c0_i32_13 : i32
    %36 = arith.select %35, %32, %12 : vector<1x128xf32>
    %c0_14 = arith.constant 0 : index
    %c0_15 = arith.constant 0 : index
    %c0_16 = arith.constant 0 : index
    %c0_17 = arith.constant 0 : index
    %37 = vector.load %arg4[%c0_14, %c0_15, %c0_16, %c0_17] : memref<1x4x8x128xf32, #tpu.memory_space<vmem>>, vector<1x4x1x128xf32>
    %38 = vector.shape_cast %37 : vector<1x4x1x128xf32> to vector<4x1x128xf32>
    %cst_18 = arith.constant dense<0x7F800000> : vector<1x128xf32>
    %39 = vector.multi_reduction <minimumf>, %38, %cst_18 [0] : vector<4x1x128xf32> to vector<1x128xf32>
    %cst_19 = arith.constant dense<0xFF800000> : vector<1x128xf32>
    %40 = vector.multi_reduction <maximumf>, %38, %cst_19 [0] : vector<4x1x128xf32> to vector<1x128xf32>
    %c1_i32_20 = arith.constant 1 : i32
    %41 = tpu.dynamic_rotate %39 by %c1_i32_20 dim 1 : vector<1x128xf32>, i32 -> vector<1x128xf32>
    %cst_21 = arith.constant 0.000000e+00 : f32
    %42 = vector.broadcast %cst_21 : f32 to vector<1x128xf32>
    %43 = arith.select %5, %42, %41 : vector<1x128xi1>, vector<1x128xf32>
    %c127_i32_22 = arith.constant 127 : i32
    %44 = tpu.dynamic_rotate %39 by %c127_i32_22 dim 1 : vector<1x128xf32>, i32 -> vector<1x128xf32>
    %cst_23 = arith.constant 0.000000e+00 : f32
    %45 = vector.broadcast %cst_23 : f32 to vector<1x128xf32>
    %46 = arith.select %6, %45, %44 : vector<1x128xi1>, vector<1x128xf32>
    %47 = arith.minimumf %43, %46 : vector<1x128xf32>
    %48 = arith.minimumf %39, %47 : vector<1x128xf32>
    %c1_i32_24 = arith.constant 1 : i32
    %49 = tpu.dynamic_rotate %40 by %c1_i32_24 dim 1 : vector<1x128xf32>, i32 -> vector<1x128xf32>
    %cst_25 = arith.constant 0.000000e+00 : f32
    %50 = vector.broadcast %cst_25 : f32 to vector<1x128xf32>
    %51 = arith.select %5, %50, %49 : vector<1x128xi1>, vector<1x128xf32>
    %c127_i32_26 = arith.constant 127 : i32
    %52 = tpu.dynamic_rotate %40 by %c127_i32_26 dim 1 : vector<1x128xf32>, i32 -> vector<1x128xf32>
    %cst_27 = arith.constant 0.000000e+00 : f32
    %53 = vector.broadcast %cst_27 : f32 to vector<1x128xf32>
    %54 = arith.select %6, %53, %52 : vector<1x128xi1>, vector<1x128xf32>
    %55 = arith.maximumf %51, %54 : vector<1x128xf32>
    %56 = arith.maximumf %40, %55 : vector<1x128xf32>
    %c0_i32_28 = arith.constant 0 : i32
    %57 = arith.cmpi slt, %arg1, %c0_i32_28 : i32
    %58 = arith.select %57, %48, %12 : vector<1x128xf32>
    %c0_i32_29 = arith.constant 0 : i32
    %59 = arith.cmpi slt, %arg1, %c0_i32_29 : i32
    %60 = arith.select %59, %56, %12 : vector<1x128xf32>
    %c0_30 = arith.constant 0 : index
    %c0_31 = arith.constant 0 : index
    %c0_32 = arith.constant 0 : index
    %c0_33 = arith.constant 0 : index
    %61 = vector.load %arg2[%c0_30, %c0_31, %c0_32, %c0_33] : memref<1x4x16x128xf32, #tpu.memory_space<vmem>>, vector<1x4x16x128xf32>
    %62 = vector.shape_cast %61 : vector<1x4x16x128xf32> to vector<4x16x128xf32>
    %cst_34 = arith.constant dense<0x7F800000> : vector<16x128xf32>
    %63 = vector.multi_reduction <minimumf>, %62, %cst_34 [0] : vector<4x16x128xf32> to vector<16x128xf32>
    %cst_35 = arith.constant dense<0xFF800000> : vector<16x128xf32>
    %64 = vector.multi_reduction <maximumf>, %62, %cst_35 [0] : vector<4x16x128xf32> to vector<16x128xf32>
    %c1_i32_36 = arith.constant 1 : i32
    %65 = tpu.dynamic_rotate %63 by %c1_i32_36 dim 1 : vector<16x128xf32>, i32 -> vector<16x128xf32>
    %cst_37 = arith.constant 0.000000e+00 : f32
    %66 = vector.broadcast %cst_37 : f32 to vector<16x128xf32>
    %67 = arith.select %2, %66, %65 : vector<16x128xi1>, vector<16x128xf32>
    %c127_i32_38 = arith.constant 127 : i32
    %68 = tpu.dynamic_rotate %63 by %c127_i32_38 dim 1 : vector<16x128xf32>, i32 -> vector<16x128xf32>
    %cst_39 = arith.constant 0.000000e+00 : f32
    %69 = vector.broadcast %cst_39 : f32 to vector<16x128xf32>
    %70 = arith.select %4, %69, %68 : vector<16x128xi1>, vector<16x128xf32>
    %71 = arith.minimumf %67, %70 : vector<16x128xf32>
    %72 = arith.minimumf %63, %71 : vector<16x128xf32>
    %c1_i32_40 = arith.constant 1 : i32
    %73 = tpu.dynamic_rotate %64 by %c1_i32_40 dim 1 : vector<16x128xf32>, i32 -> vector<16x128xf32>
    %cst_41 = arith.constant 0.000000e+00 : f32
    %74 = vector.broadcast %cst_41 : f32 to vector<16x128xf32>
    %75 = arith.select %2, %74, %73 : vector<16x128xi1>, vector<16x128xf32>
    %c127_i32_42 = arith.constant 127 : i32
    %76 = tpu.dynamic_rotate %64 by %c127_i32_42 dim 1 : vector<16x128xf32>, i32 -> vector<16x128xf32>
    %cst_43 = arith.constant 0.000000e+00 : f32
    %77 = vector.broadcast %cst_43 : f32 to vector<16x128xf32>
    %78 = arith.select %4, %77, %76 : vector<16x128xi1>, vector<16x128xf32>
    %79 = arith.maximumf %75, %78 : vector<16x128xf32>
    %80 = arith.maximumf %64, %79 : vector<16x128xf32>
    %c1_i32_44 = arith.constant 1 : i32
    %81 = tpu.dynamic_rotate %72 by %c1_i32_44 dim 0 : vector<16x128xf32>, i32 -> vector<16x128xf32>
    %82 = vector.shape_cast %34 : vector<1x128xf32> to vector<1x128xf32>
    %83 = vector.broadcast %82 : vector<1x128xf32> to vector<16x128xf32>
    %84 = arith.select %9, %83, %81 : vector<16x128xi1>, vector<16x128xf32>
    %c15_i32_45 = arith.constant 15 : i32
    %85 = tpu.dynamic_rotate %72 by %c15_i32_45 dim 0 : vector<16x128xf32>, i32 -> vector<16x128xf32>
    %86 = vector.shape_cast %58 : vector<1x128xf32> to vector<1x128xf32>
    %87 = vector.broadcast %86 : vector<1x128xf32> to vector<16x128xf32>
    %88 = arith.select %11, %87, %85 : vector<16x128xi1>, vector<16x128xf32>
    %89 = arith.minimumf %84, %88 : vector<16x128xf32>
    %90 = arith.minimumf %72, %89 : vector<16x128xf32>
    %c1_i32_46 = arith.constant 1 : i32
    %91 = tpu.dynamic_rotate %80 by %c1_i32_46 dim 0 : vector<16x128xf32>, i32 -> vector<16x128xf32>
    %92 = vector.shape_cast %36 : vector<1x128xf32> to vector<1x128xf32>
    %93 = vector.broadcast %92 : vector<1x128xf32> to vector<16x128xf32>
    %94 = arith.select %9, %93, %91 : vector<16x128xi1>, vector<16x128xf32>
    %c15_i32_47 = arith.constant 15 : i32
    %95 = tpu.dynamic_rotate %80 by %c15_i32_47 dim 0 : vector<16x128xf32>, i32 -> vector<16x128xf32>
    %96 = vector.shape_cast %60 : vector<1x128xf32> to vector<1x128xf32>
    %97 = vector.broadcast %96 : vector<1x128xf32> to vector<16x128xf32>
    %98 = arith.select %11, %97, %95 : vector<16x128xi1>, vector<16x128xf32>
    %99 = arith.maximumf %94, %98 : vector<16x128xf32>
    %100 = arith.maximumf %80, %99 : vector<16x128xf32>
    %101 = arith.subf %100, %90 : vector<16x128xf32>
    %cst_48 = arith.constant 0.949999988 : f32
    %102 = vector.broadcast %cst_48 : f32 to vector<16x128xf32>
    %103 = arith.cmpf ogt, %101, %102 : vector<16x128xf32>
    %104 = arith.extui %103 : vector<16x128xi1> to vector<16x128xi32>
    %105 = arith.sitofp %104 : vector<16x128xi32> to vector<16x128xf32>
    %c0_49 = arith.constant 0 : index
    %c0_50 = arith.constant 0 : index
    %c0_51 = arith.constant 0 : index
    %c0_52 = arith.constant 0 : index
    %106 = vector.load %arg5[%c0_49, %c0_50, %c0_51, %c0_52] : memref<1x1x16x128xf32, #tpu.memory_space<vmem>>, vector<1x1x16x128xf32>
    %107 = vector.shape_cast %106 : vector<1x1x16x128xf32> to vector<16x128xf32>
    %108 = vector.shape_cast %105 : vector<16x128xf32> to vector<1x1x16x128xf32>
    tpu.vector_store %arg5[%c0_49, %c0_50, %c0_51, %c0_52], %108 {strides = array<i32>} : memref<1x1x16x128xf32, #tpu.memory_space<vmem>>, vector<1x1x16x128xf32>,
    return
  }
  func.func @transform_0(%arg0: i32, %arg1: i32) -> (i32, i32, i32, i32) {
    %c0_i32 = arith.constant 0 : i32
    %c0_i32_0 = arith.constant 0 : i32
    %c0_i32_1 = arith.constant 0 : i32
    return %arg0, %c0_i32, %arg1, %c0_i32_0 : i32, i32, i32, i32
  }
  func.func @transform_1(%arg0: i32, %arg1: i32) -> (i32, i32, i32, i32) {
    %c2_i32 = arith.constant 2 : i32
    %0 = arith.muli %arg1, %c2_i32 : i32
    %c1_i32 = arith.constant 1 : i32
    %1 = arith.subi %0, %c1_i32 : i32
    %c0_i32 = arith.constant 0 : i32
    %2 = arith.maxsi %1, %c0_i32 : i32
    %c0_i32_0 = arith.constant 0 : i32
    %c0_i32_1 = arith.constant 0 : i32
    %c0_i32_2 = arith.constant 0 : i32
    return %arg0, %c0_i32_0, %2, %c0_i32_1 : i32, i32, i32, i32
  }
  func.func @transform_2(%arg0: i32, %arg1: i32) -> (i32, i32, i32, i32) {
    %c1_i32 = arith.constant 1 : i32
    %0 = arith.addi %arg1, %c1_i32 : i32
    %c2_i32 = arith.constant 2 : i32
    %1 = arith.muli %0, %c2_i32 : i32
    %c1_i32_0 = arith.constant 1 : i32
    %2 = arith.minsi %1, %c1_i32_0 : i32
    %c0_i32 = arith.constant 0 : i32
    %c0_i32_1 = arith.constant 0 : i32
    %c0_i32_2 = arith.constant 0 : i32
    return %arg0, %c0_i32, %2, %c0_i32_1 : i32, i32, i32, i32
  }
  func.func @transform_3(%arg0: i32, %arg1: i32) -> (i32, i32, i32, i32) {
    %c0_i32 = arith.constant 0 : i32
    %c0_i32_0 = arith.constant 0 : i32
    %c0_i32_1 = arith.constant 0 : i32
    return %arg0, %c0_i32, %arg1, %c0_i32_0 : i32, i32, i32, i32
  }
}

</mosaic_0001>

<bundles_post_ra>
// kernel: tpu_custom_call.1
= control target key start
LH: loop header
LB: loop body
LE: loop exit
PB: predicated region body
PF: predicated region fallthrough
CT: control target
= control target key end

     0   :  { %s1293_s0 = inlined_call_operand.hbm [shape: f32[2,4,16,128], index: 0, kind: input, shape index: {}]   ;;  %s1294_s1 = inlined_call_operand.hbm [shape: f32[2,4,16,128], index: 1, kind: input, shape index: {}]   ;;  %s1295_s2 = inlined_call_operand.hbm [shape: f32[2,4,16,128], index: 2, kind: input, shape index: {}]   ;;  %s1296_s3 = inlined_call_operand.hbm [shape: f32[2,1,16,128], index: 3, kind: output, shape index: {}]  }
   0x1   :  { %1307 = sst [smem:[#allocation16_spill]] %s1294_s1 }
   0x2   :  { %8 = vsyncpa [#allocation3], 0 }
   0x3   :  { %10 = vsyncpa [#allocation3 + $0x1], 0 }
   0x4   :  { %11 = vsyncpa [#allocation6], 0 }
   0x5   :  { %13 = vsyncpa [#allocation6 + $0x1], 0 }
   0x6   :  { %14 = vsyncpa [#allocation4], 0 }
   0x7   :  { %16 = vsyncpa [#allocation4 + $0x1], 0  ;;  %s999_s12 = smov 0   ;;  %s1001_s13 = smov 0  }
   0x8   :  { %s1003_s14 = smov 0   ;;  %s1005_s15 = smov 0  }
   0x9   :  { %s1007_s16 = smov 0   ;;  %s1009_s17 = smov 0  }
   0xa LB: > { %1308 = sst [smem:[#allocation12_spill]] %s953_s14  ;;  %s1030_s18 = sadd.s32 4294967295, %s965_s17   ;;  %s965_s17 = sphi %s1009_s17, %s22_s17   ;;  %s961_s16 = sphi %s1007_s16, %s1331_s16   ;;  %s957_s15 = sphi %s1005_s15, %s1330_s15   ;;  %s953_s14 = sphi %s1003_s14, %s1329_s14   ;;  %s949_s13 = sphi %s1001_s13, %s1333_s13   ;;  %s945_s12 = sphi %s999_s12, %s1332_s12  }
   0xb   : > { %1309 = sst [smem:[#allocation13_spill]] %s961_s16  ;;  %s679_s19 = sadd.s32 4294967294, %s965_s17  }
   0xc   : > { %s34_s20 = sadd.s32 1, %s961_s16  ;;  %s43_s21 = sadd.s32 1, %s953_s14 }
   0xd   : > { %p36_p0 = scmp.ge.s32.totalorder %s34_s20, 2  ;;  %p50_p1 = scmp.ne.s32.totalorder %s953_s14, %s949_s13 }
   0xe   : > { %p51_p2 = scmp.eq.s32.totalorder %s965_s17, 0  ;;  %p56_p3 = scmp.ne.s32.totalorder %s949_s13, %s945_s12 }
   0xf   : > { %s1335_s20 = smov (%p36_p0, %s34_s20), 0  ;;  %p57_p5 = scmp.eq.s32.totalorder %s1030_s18, 0 }
  0x10   : > { %1310 = sst [smem:[#allocation14_spill]] %s1335_s20  ;;  %p1042_p4 = por %p51_p2, %p50_p1 }
  0x11   : > { %s38_s23 = ssub.s32 %s961_s16, %s1335_s20  ;;  %p154_p6 = scmp.eq.s32.totalorder %s1030_s18, 1 }
  0x12   : > { %p41_p7 = scmp.eq.s32.totalorder %s38_s23, 0  ;;  %p1050_p8 = por %p57_p5, %p56_p3 }
  0x13   : > { %p1054_p9 = por %p154_p6, %p50_p1  ;;  %p160_p10 = scmp.eq.s32.totalorder %s679_s19, 1 }
  0x14   : > { %s1312_s24 = scalar_select %p1050_p8, 1, 0 }
  0x15   : > { %s1313_s25 = scalar_select %p1054_p9, 1, 0 }
  0x16   : > { %s1059_s26 = scalar_select %p41_p7, %s953_s14, %s43_s21  }
  0x17   : > { %p1061_p11 = por %p160_p10, %p56_p3  ;;  %p731_p13 = scmp.lt.s32.totalorder %s965_s17, 2 }
  0x18   : > { %1314 = sst [smem:[#allocation15_spill]] %s1059_s26  ;;  %s1068_s28 = sand.u32 1, %s953_s14  }
  0x19   : > { %s1315_s27 = scalar_select %p1061_p11, 1, 0 }
  0x1a   : > { %s1071_s29 = sshll.u32 %s961_s16, 10  ;;  %p1075_p0 = pnand %p731_p13, %p1042_p4 }
  0x1b   : > { %s203_s4 = sand.u32 1, %s965_s17   ;;  %s685_s5 = sshll.u32 %s1068_s28, 5 }
  0x1c   : > { %s1317_s1 = sld [smem:[#allocation16_spill]]  ;;  %s207_s9 = scalar_lea.vmem [#allocation5], %s685_s5 }
  0x1d   : > { %s219_s10 = sshll.u32 %s207_s9, 4  ;;  %s1091_s11 = scalar_lea.sflag [#allocation6], %s203_s4  ;;  %s1089_s10 = int_to_ptr.vmem [resolvable:$true] %s219_s10 }
  0x1e   : > { %p1097_p2 = pneg %p1075_p0 }
  0x22   : > { %s1085_s8 = scalar_lea.hbm %s1317_s1, %s1071_s29  ;;  %s794_s6 = scalar_lea.hbm %s1317_s1, 2048 }
  0x23   : > { %s789_s19 = scalar_lea.hbm %s1085_s8, 512  ;;  %p795_p5 = scmp.lt.u32.totalorder %s1085_s8, %s1317_s1 }
  0x24   : > { %p790_p1 = scmp.ne.s32.totalorder %s1085_s8, %s789_s19  ;;  %p796_p6 = scmp.lt.u32.totalorder %s794_s6, %s789_s19 }
  0x25   : > { %p798_p10 = scmp.lt.u32.totalorder %s789_s19, %s1085_s8 }
  0x26   : > { %p792_p3 = pnand %p1097_p2, %p790_p1  ;;  %p797_p7 = por %p796_p6, %p795_p5 }
  0x28   : > { %p793_p4 = pneg %p792_p3  ;;  %p799_p13 = por %p798_p10, %p797_p7 }
  0x2a   : > { %p800_p12 = pnand %p799_p13, %p793_p4 }
  0x2c   : > { %803 = shalt.err (!%p800_p12)
}
  0x2d   : > { %s804_s4 = scalar_lea.vmem %s1089_s10, 512  ;;  %s967_s22 = smov [#allocation5]  }
  0x2e   : > { %p805_p1 = scmp.ne.s32.totalorder %s1089_s10, %s804_s4  ;;  %s809_s23 = sshll.u32 %s967_s22, 4  ;;  %s810_s23 = int_to_ptr.vmem [resolvable:$false] %s809_s23 }
  0x2f   : > { %s811_s7 = scalar_lea.vmem %s810_s23, 1024  ;;  %p812_p9 = scmp.lt.s32.totalorder %s1089_s10, %s810_s23 }
  0x30   : > { %p807_p3 = pnand %p805_p1, %p1097_p2  ;;  %p813_p8 = scmp.lt.s32.totalorder %s811_s7, %s804_s4 }
  0x32   : > { %p808_p11 = pneg %p807_p3  ;;  %p814_p5 = por %p813_p8, %p812_p9 }
  0x34   : > { %p815_p6 = pnand %p814_p5, %p808_p11 }
  0x36   : > { %818 = shalt.err (!%p815_p6)
}
  0x37   : > { %s1301_s19 = smov 256   ;;  %s1302_s6 = smov 128  }
  0x38   : > { %s1304_s9 = smov 8   ;;  %s233_s4 = scalar_lea.vmem [#allocation7], %s685_s5 }
  0x39   : > { %723 = dma.hbm_to_vmem [thread:$0]  (!%p1075_p0), %s1085_s8, 512, %s1089_s10, %s1091_s11, %s1301_s19, %s1302_s6, %s1304_s9  }
  0x3a   : > { %s245_s22 = sshll.u32 %s233_s4, 4  ;;  %p691_p8 = scmp.ge.s32.totalorder %s965_s17, 1  ;;  %s1127_s22 = int_to_ptr.vmem [resolvable:$true] %s245_s22 }
  0x3b   : > { %p253_p9 = scmp.lt.s32.totalorder %s965_s17, 3  ;;  %s682_s7 = sshll.u32 %s1068_s28, 6 }
  0x3c   : > { %s1139_s16 = scalar_lea.hbm %s1293_s0, %s1071_s29  ;;  %s706_s5 = sadd.s32 128, %s1071_s29 }
  0x3d   : > { %p1130_p11 = pnand %p691_p8, %p253_p9  ;;  %s184_s8 = scalar_lea.vmem [#allocation2], %s682_s7 }
  0x3e   : > { %s193_s10 = sshll.u32 %s184_s8, 4  ;;  %s1145_s6 = scalar_lea.hbm %s1295_s2, %s706_s5  ;;  %s1147_s10 = int_to_ptr.vmem [resolvable:$true] %s193_s10 }
  0x3f   : > { %s1319_s23 = scalar_select %p1130_p11, 1, 0 }
  0x40   : > { %s181_s9 = scalar_lea.sflag [#allocation3], %s1068_s28  ;;  %s819_s26 = scalar_lea.hbm %s1139_s16, 1024 }
  0x41   : > { %p820_p12 = scmp.ne.s32.totalorder %s1139_s16, %s819_s26  ;;  %s824_s14 = scalar_lea.hbm %s1293_s0, 2048 }
  0x42   : > { %p825_p10 = scmp.lt.u32.totalorder %s1139_s16, %s1293_s0  ;;  %p826_p13 = scmp.lt.u32.totalorder %s824_s14, %s819_s26 }
  0x43   : > { %p822_p4 = pnand %p820_p12, %p1097_p2  ;;  %p828_p3 = scmp.lt.u32.totalorder %s819_s26, %s1139_s16 }
  0x44   : > { %p827_p1 = por %p826_p13, %p825_p10 }
  0x45   : > { %p823_p7 = pneg %p822_p4 }
  0x46   : > { %p829_p5 = por %p828_p3, %p827_p1 }
  0x48   : > { %p830_p6 = pnand %p829_p5, %p823_p7 }
  0x4a   : > { %833 = shalt.err (!%p830_p6)
}
  0x4b   : > { %s834_s19 = scalar_lea.vmem %s1147_s10, 1024  ;;  %s971_s5 = smov [#allocation2]  }
  0x4c   : > { %p835_p8 = scmp.ne.s32.totalorder %s1147_s10, %s834_s19  ;;  %s839_s8 = sshll.u32 %s971_s5, 4  ;;  %s840_s8 = int_to_ptr.vmem [resolvable:$false] %s839_s8 }
  0x4d   : > { %s841_s4 = scalar_lea.vmem %s840_s8, 2048  ;;  %p842_p4 = scmp.lt.s32.totalorder %s1147_s10, %s840_s8 }
  0x4e   : > { %p837_p9 = pnand %p835_p8, %p1097_p2  ;;  %p843_p11 = scmp.lt.s32.totalorder %s841_s4, %s834_s19 }
  0x50   : > { %p838_p12 = pneg %p837_p9  ;;  %p844_p10 = por %p843_p11, %p842_p4 }
  0x52   : > { %p845_p13 = pnand %p844_p10, %p838_p12 }
  0x54   : > { %848 = shalt.err (!%p845_p13)
}
  0x55   : > { %s1320_s14 = smov 8   ;;  %s1321_s26 = smov 128  }
  0x56   : > { %720 = dma.hbm_to_vmem [thread:$0]  (!%p1075_p0), %s1139_s16, 1024, %s1147_s10, %s181_s9, %s1321_s26, %s1321_s26, %s1320_s14  }
  0x57   : > { %s849_s1 = scalar_lea.hbm %s1145_s6, 512  ;;  %s854_s7 = scalar_lea.hbm %s1295_s2, 2048 }
  0x58   : > { %p850_p7 = scmp.ne.s32.totalorder %s1145_s6, %s849_s1  ;;  %p855_p3 = scmp.lt.u32.totalorder %s1145_s6, %s1295_s2 }
  0x59   : > { %p856_p5 = scmp.lt.u32.totalorder %s854_s7, %s849_s1  ;;  %p858_p8 = scmp.lt.u32.totalorder %s849_s1, %s1145_s6 }
  0x5a   : > { %p852_p11 = pnand %p850_p7, %p1097_p2 }
  0x5b   : > { %p857_p6 = por %p856_p5, %p855_p3 }
  0x5c   : > { %p853_p1 = pneg %p852_p11 }
  0x5d   : > { %p859_p9 = por %p858_p8, %p857_p6 }
  0x5f   : > { %p860_p12 = pnand %p859_p9, %p853_p1 }
  0x61   : > { %863 = shalt.err (!%p860_p12)
}
  0x62   : > { %s864_s16 = scalar_lea.vmem %s1127_s22, 512  ;;  %s972_s28 = smov [#allocation7]  }
  0x63   : > { %p865_p4 = scmp.ne.s32.totalorder %s1127_s22, %s864_s16  ;;  %s869_s9 = sshll.u32 %s972_s28, 4  ;;  %s870_s9 = int_to_ptr.vmem [resolvable:$false] %s869_s9 }
  0x64   : > { %s871_s10 = scalar_lea.vmem %s870_s9, 1024  ;;  %p872_p7 = scmp.lt.s32.totalorder %s1127_s22, %s870_s9 }
  0x65   : > { %p867_p10 = pnand %p865_p4, %p1097_p2  ;;  %p873_p11 = scmp.lt.s32.totalorder %s871_s10, %s864_s16 }
  0x67   : > { %p868_p13 = pneg %p867_p10  ;;  %p874_p3 = por %p873_p11, %p872_p7 }
  0x69   : > { %p875_p5 = pnand %p874_p3, %p868_p13 }
  0x6b   : > { %878 = shalt.err (!%p875_p5)
}
  0x6c   : > { %s1322_s8 = smov 256   ;;  %p1323_p2 = scmp.ne.s32.totalorder %s1319_s23, 0 }
  0x6d   : > { %726 = dma.hbm_to_vmem [thread:$0]  (!%p1075_p0), %s1145_s6, 512, %s1127_s22, %s1091_s11, %s1322_s8, %s1321_s26, %s1320_s14  }
  0x6e   : > { %257 = sbr.rel (%p1323_p2) target bundleno = 286 (0x11e), region = 32  ;;  %s1204_s21 = sand.u32 (!%p1323_p2), 1, %s949_s13  }
  0x6f   : > { %s692_s4 = sshll.u32 (!%p1323_p2), %s1204_s21, 6  ;;  %s260_s1 = scalar_lea.sflag (!%p1323_p2), [#allocation3], %s1204_s21 }
  0x70   : > { %s263_s20 = scalar_lea.vmem (!%p1323_p2), [#allocation2], %s692_s4  ;;  %p1324_p1 = scmp.ne.s32.totalorder (!%p1323_p2), %s1312_s24, 0 }
  0x75   : > { %932 = dma.done.wait (%p1324_p1), %s260_s1, 1024  }
  0x76   : > { %934 = vsyncadd (%p1324_p1), %s260_s1, 4294966272  ;;  %s268_s30 = sand.u32 1, %s1030_s18  }
  0x77   : > { %s269_s11 = scalar_lea.sflag [#allocation6], %s268_s30 }
  0x78   : > { %936 = dma.done.wait (%p1324_p1), %s269_s11, 1024  }
  0x79   : > { %938 = vsyncadd (%p1324_p1), %s269_s11, 4294966272  ;;  %v416_v0 = vld [vmem:[%s263_s20] sm:$0xff]  ;;  %v418_v1 = vld [vmem:[%s263_s20 + $0x10] sm:$0xff]  ;;  %s973_s18 = smov 127   ;;  %s974_s6 = smov 1   ;;  %v324_v20 = vlaneseq  ;;  %v975_v43 = vmov 0.0  }
  0x7a   : > { %v420_v2 = vld [vmem:[%s263_s20 + $0x20] sm:$0xff]  ;;  %v422_v3 = vld [vmem:[%s263_s20 + $0x30] sm:$0xff]  ;;  %v417_v5 = vld [vmem:[%s263_s20 + $0x8] sm:$0xff]  ;;  %s695_s24 = sshll.u32 %s1204_s21, 4  ;;  %s707_s22 = sshll.u32 %s957_s15, 8 }
  0x7b   : > { %v424_v4 = vmin.f32 %v416_v0, %v420_v2  ;;  %v419_v6 = vld [vmem:[%s263_s20 + $0x18] sm:$0xff]  ;;  %v425_v7 = vmin.f32 %v418_v1, %v422_v3  ;;  %v421_v8 = vld [vmem:[%s263_s20 + $0x28] sm:$0xff]  ;;  %v430_v13 = vmax.f32 %v416_v0, %v420_v2  ;;  %v431_v14 = vmax.f32 %v418_v1, %v422_v3  ;;  %s313_s23 = scalar_lea.vmem [#allocation8], %s695_s24  ;;  %s1242_s7 = scalar_lea.hbm %s1296_s3, %s707_s22 }
  0x7c   : > { %v423_v9 = vld [vmem:[%s263_s20 + $0x38] sm:$0xff]  ;;  %v427_v10 = vmin.f32 %v417_v5, %v421_v8  ;;  %v433_v16 = vmax.f32 %v417_v5, %v421_v8  ;;  %v325_v21 = vand.u32 127, %v324_v20  ;;  %v329_v26 = vshrl.u32 %v324_v20, 7  ;;  %s544_s14 = sshll.u32 %s313_s23, 4  ;;  %s529_s15 = scalar_lea.sflag [#allocation4], %s1204_s21  ;;  %s1244_s14 = int_to_ptr.vmem [resolvable:$true] %s544_s14 }
  0x7d   : > { %v428_v11 = vmin.f32 %v419_v6, %v423_v9  ;;  %v426_v12 = vmin.f32 %v424_v4, %v425_v7  ;;  %v434_v17 = vmax.f32 %v419_v6, %v423_v9  ;;  %v432_v19 = vmax.f32 %v430_v13, %v431_v14  ;;  %s879_s19 = scalar_lea.vmem %s1244_s14, 256  ;;  %p1325_p6 = scmp.ne.s32.totalorder %s1313_s25, 0 }
  0x7e   : > { %vm327_vm0 = vcmp.eq.s32.totalorder %v325_v21, 127  ;;  %vm326_vm1 = vcmp.eq.s32.totalorder %v325_v21, 0  ;;  %v330_v34 = vadd.s32 8, %v329_v26  ;;  %v475_v35 = vsub.s32 0, %v329_v26  ;;  %p880_p0 = scmp.ne.s32.totalorder %s1244_s14, %s879_s19  ;;  %s976_s5 = smov [#allocation8]  }
  0x7f   : > { %442 = vrot.lane.b32.xlu1 %v426_v12, %s973_s18  ;;  %436 = vrot.lane.b32.xlu0 %v426_v12, %s974_s6  ;;  %v429_v15 = vmin.f32 %v427_v10, %v428_v11  ;;  %v435_v18 = vmax.f32 %v433_v16, %v434_v17  ;;  %vm470_vm2 = vcmp.lt.s32.totalorder %v329_v26, 1  ;;  %vm481_vm3 = vcmp.lt.s32.totalorder %v329_v26, 7  ;;  %s883_s16 = sshll.u32 %s976_s5, 4  ;;  %s884_s16 = int_to_ptr.vmem [resolvable:$false] %s883_s16 }
  0x80   : > { %vm334_vm4 = vcmp.eq.s32.totalorder %v330_v34, 15  ;;  %v476_v44 = vrot.slane %v975_v43, %v475_v35  ;;  %vm331_vm5 = vcmp.eq.s32.totalorder %v329_v26, 0  ;;  %p881_p8 = pnand %p880_p0, %p1325_p6  ;;  %s885_s28 = scalar_lea.vmem %s884_s16, 512 }
  0x81   : > { %p886_p12 = scmp.lt.s32.totalorder %s1244_s14, %s884_s16  ;;  %p887_p4 = scmp.lt.s32.totalorder %s885_s28, %s879_s19 }
  0x82   : > { %p882_p9 = pneg %p881_p8 }
  0x83   : > { %444 = vrot.lane.b32.xlu1 %v429_v15, %s973_s18  ;;  %438 = vrot.lane.b32.xlu0 %v429_v15, %s974_s6  ;;  %p888_p10 = por %p887_p4, %p886_p12 }
  0x85   : > { %p889_p13 = pnand %p888_p10, %p882_p9 }
  0x87   : > { %454 = vrot.lane.b32.xlu1 %v435_v18, %s974_s6  ;;  %452 = vrot.lane.b32.xlu0 %v432_v19, %s974_s6 }
  0x8b   : > { %460 = vrot.lane.b32.xlu1 %v435_v18, %s973_s18  ;;  %458 = vrot.lane.b32.xlu0 %v432_v19, %s973_s18 }
  0xf1   : > { %v443_v22 = vpop.permute.xlu1 %442  ;;  %v437_v23 = vpop.permute.xlu0 %436 }
  0xf2   : > { %v446_v24 = vsel %vm327_vm0, 0.0, %v443_v22  ;;  %v440_v25 = vsel %vm326_vm1, 0.0, %v437_v23 }
  0xf3   : > { %v448_v27 = vmin.f32 %v440_v25, %v446_v24 }
  0xf5   : > { %v445_v28 = vpop.permute.xlu1 %444  ;;  %v439_v29 = vpop.permute.xlu0 %438  ;;  %v450_v33 = vmin.f32 %v426_v12, %v448_v27 }
  0xf6   : > { %v447_v30 = vsel %vm327_vm0, 0.0, %v445_v28  ;;  %v441_v31 = vsel %vm326_vm1, 0.0, %v439_v29 }
  0xf7   : > { %v449_v32 = vmin.f32 %v441_v31, %v447_v30  ;;  %v468_v41 = vrot.slane %v450_v33, 7  ;;  %v479_v42 = vrot.slane %v450_v33, 1 }
  0xf9   : > { %v451_v36 = vmin.f32 %v429_v15, %v449_v32  ;;  %v455_v37 = vpop.permute.xlu1 %454  ;;  %v453_v38 = vpop.permute.xlu0 %452 }
  0xfa   : > { %v457_v45 = vsel %vm326_vm1, 0.0, %v455_v37  ;;  %v456_v46 = vsel %vm326_vm1, 0.0, %v453_v38 }
  0xfb   : > { %v469_v39 = vrot.slane %v451_v36, 7  ;;  %v480_v40 = vrot.slane %v451_v36, 1 }
  0xfd   : > { %v461_v47 = vpop.permute.xlu1 %460  ;;  %v459_v48 = vpop.permute.xlu0 %458  ;;  %v472_v49 = vsel %vm470_vm2, %v469_v39, %v468_v41  ;;  %v483_v50 = vsel %vm481_vm3, %v480_v40, %v479_v42  ;;  %v471_v55 = vsel %vm470_vm2, %v468_v41, %v469_v39  ;;  %v482_v56 = vsel %vm481_vm3, %v479_v42, %v480_v40 }
  0xfe   : > { %v463_v51 = vsel %vm327_vm0, 0.0, %v461_v47  ;;  %v462_v52 = vsel %vm327_vm0, 0.0, %v459_v48  ;;  %v489_v57 = vsel %vm334_vm4, %v476_v44, %v483_v50  ;;  %v477_v59 = vsel %vm331_vm5, %v476_v44, %v472_v49 }
  0xff   : > { %v465_v53 = vmax.f32 %v457_v45, %v463_v51  ;;  %v464_v54 = vmax.f32 %v456_v46, %v462_v52  ;;  %v491_v1 = vmin.f32 %v471_v55, %v489_v57  ;;  %v490_v2 = vmin.f32 %v477_v59, %v482_v56 }
 0x101   : > { %v467_v58 = vmax.f32 %v435_v18, %v465_v53  ;;  %v466_v60 = vmax.f32 %v432_v19, %v464_v54  ;;  %v493_v11 = vmin.f32 %v451_v36, %v491_v1  ;;  %v492_v12 = vmin.f32 %v450_v33, %v490_v2 }
 0x103   : > { %v495_v61 = vrot.slane %v467_v58, 7  ;;  %v505_v62 = vrot.slane %v467_v58, 1  ;;  %v494_v63 = vrot.slane %v466_v60, 7  ;;  %v504_v0 = vrot.slane %v466_v60, 1 }
 0x105   : > { %v496_v3 = vsel %vm470_vm2, %v494_v63, %v495_v61  ;;  %v497_v4 = vsel %vm470_vm2, %v495_v61, %v494_v63  ;;  %v506_v5 = vsel %vm481_vm3, %v504_v0, %v505_v62  ;;  %v507_v6 = vsel %vm481_vm3, %v505_v62, %v504_v0 }
 0x106   : > { %v502_v7 = vsel %vm331_vm5, %v476_v44, %v497_v4  ;;  %v513_v8 = vsel %vm334_vm4, %v476_v44, %v507_v6 }
 0x107   : > { %v514_v9 = vmax.f32 %v502_v7, %v506_v5  ;;  %v515_v10 = vmax.f32 %v496_v3, %v513_v8 }
 0x109   : > { %v516_v13 = vmax.f32 %v466_v60, %v514_v9  ;;  %v517_v14 = vmax.f32 %v467_v58, %v515_v10 }
 0x10b   : > { %v518_v15 = vsub.f32 %v516_v13, %v492_v12  ;;  %v519_v16 = vsub.f32 %v517_v14, %v493_v11 }
 0x10d   : > { %vm520_vm6 = vcmp.gt.f32.partialorder %v518_v15, 0.95  ;;  %vm521_vm7 = vcmp.gt.f32.partialorder %v519_v16, 0.95 }
 0x10e   : > { %v696_v17 = vsel %vm520_vm6, 1.0, %v975_v43  ;;  %v697_v18 = vsel %vm521_vm7, 1.0, %v975_v43 }
 0x10f   : > { %526 = vst [vmem:[%s313_s23] sm:$0xff] %v696_v17  ;;  %527 = vst [vmem:[%s313_s23 + $0x8] sm:$0xff] %v697_v18 }
 0x110   : > { %892 = shalt.err (!%p889_p13)
}
 0x111   : > { %s893_s9 = scalar_lea.hbm %s1242_s7, 256  ;;  %s897_s4 = scalar_lea.hbm %s1296_s3, 512 }
 0x112   : > { %p894_p7 = scmp.ne.s32.totalorder %s1242_s7, %s893_s9  ;;  %p898_p5 = scmp.lt.u32.totalorder %s1242_s7, %s1296_s3 }
 0x113   : > { %p899_p2 = scmp.lt.u32.totalorder %s897_s4, %s893_s9  ;;  %p901_p0 = scmp.lt.u32.totalorder %s893_s9, %s1242_s7 }
 0x114   : > { %p895_p11 = pnand %p894_p7, %p1325_p6 }
 0x115   : > { %p900_p1 = por %p899_p2, %p898_p5 }
 0x116   : > { %p896_p3 = pneg %p895_p11 }
 0x117   : > { %p902_p8 = por %p901_p0, %p900_p1 }
 0x119   : > { %p903_p9 = pnand %p902_p8, %p896_p3 }
 0x11b   : > { %906 = shalt.err (!%p903_p9)
}
 0x11c   : > { %s977_s30 = smov 128   ;;  %s978_s11 = smov 8  }
 0x11d   : > { %715 = dma.vmem_to_hbm [thread:$0]  (%p1325_p6), %s1244_s14, 256, %s1242_s7, %s529_s15, %s977_s30, %s977_s30, %s978_s11  }
 0x11e PF: > { %s559_s18 = sand.u32 1, %s945_s12   ;;  %p1326_p12 = scmp.ne.s32.totalorder %s1315_s27, 0 }
 0x11f   : > { %p1327_p4 = scmp.ge.s32.totalorder %s965_s17, 2  ;;  %s560_s6 = scalar_lea.sflag [#allocation4], %s559_s18 }
 0x121   : > { %p728_p10 = pnand %p1327_p4, %p1326_p12 }
 0x123   : > { %940 = dma.done.wait (!%p728_p10), %s560_s6, 256  }
 0x124   : > { %942 = vsyncadd (!%p728_p10), %s560_s6, 4294967040  ;;  %s22_s17 = sadd.s32 1, %s965_s17   ;;  %s1328_s24 = sld [smem:[#allocation12_spill]] }
 0x125   : > { %p19_p13 = scmp.ge.s32.totalorder %s22_s17, 4   ;;  %s1329_s14 = sld [smem:[#allocation15_spill]] }
 0x126   : > { %s1330_s15 = sld [smem:[#allocation13_spill]]  ;;  %s1331_s16 = sld [smem:[#allocation14_spill]] }
 0x127   : > { %s1332_s12 = smov %s949_s13  ;;  %21 = sbr.rel (!%p19_p13) target bundleno = 10 (0xa), region = 101 }
 0x12a   : > { %s1333_s13 = smov %s1328_s24 }
 0x12e   :  { %565 = vsyncpa [#allocation3], 1 }
 0x12f   :  { %567 = vsyncpa [#allocation3 + $0x1], 1 }
 0x130   :  { %568 = vsyncpa [#allocation6], 1 }
 0x131   :  { %570 = vsyncpa [#allocation6 + $0x1], 1 }
 0x132   :  { %571 = vsyncpa [#allocation4], 1 }
 0x133   :  { %573 = vsyncpa [#allocation4 + $0x1], 1 }

</bundles_post_ra>
